<compile_context>
chip_gen: v7x
topology: tpu7x:2x2x1
jax: 0.10.0
libtpu: 0.0.40
codegen_flags: <defaults>
</compile_context>

<pallas_src>
import functools

import jax
import jax.numpy as jnp
from jax import lax
from jax.experimental import pallas as pl
from jax.experimental.pallas import tpu as pltpu


def _round_up(v, m):
    return (v + m - 1) // m * m


def _sublane_align(*dtypes):
    # rows per packed sublane: 8 for 4-byte, 16 for 2-byte, 32 for 1-byte dtypes
    return max(max(8, 32 // jnp.dtype(d).itemsize) for d in dtypes)


def _vmem_capacity_bytes():
    try:
        return int(pltpu.get_tpu_info().vmem_capacity_bytes)
    except Exception:
        return 64 << 20        # conservative fallback (v7x per-TC VMEM)


def _node_encoder_kernel(tid_ref, x_ref, w_ref, p_ref, o_ref, *,
                         inv_h, h_real, hp):
    # tid_ref (scalar-prefetched per-tile type id) is only consumed by the
    # BlockSpec index_maps; unused in the body.
    del tid_ref

    # Linear: x @ W (MXU, f32 accumulation) + bias.
    h = jnp.dot(x_ref[...], w_ref[...], preferred_element_type=jnp.float32)
    p = p_ref[...]                      # (3, Hp): rows = bias, gamma, beta
    h = h + p[0:1, :]

    # Two-pass LayerNorm in f32 over the real hidden dim. Padded lanes of h
    # are exactly 0 (W/b zero-padded), so sum over Hp == sum over H and
    # dividing by the real H (inv_h) is exact for the mean. The centred values
    # of padded lanes are masked to 0 before the variance reduction so the
    # padding never contributes (and no E[h^2]-E[h]^2 cancellation).
    mean = jnp.sum(h, axis=-1, keepdims=True) * inv_h
    centered = h - mean
    if hp != h_real:                                   # static at trace time
        lane = lax.broadcasted_iota(jnp.int32, centered.shape, 1)
        centered = jnp.where(lane < h_real, centered, 0.0)
    var = jnp.sum(centered * centered, axis=-1, keepdims=True) * inv_h
    y = centered * lax.rsqrt(var + 1e-5)               # eps = 1e-5 (torch)
    y = y * p[1:2, :] + p[2:3, :]                      # padded gamma/beta = 0

    # ReLU; Dropout(p=0.2) in eval mode is identity.
    y = jnp.maximum(y, 0.0)
    o_ref[...] = y.astype(o_ref.dtype)


def make_node_encoder(params, *, tm=None, compute_dtype=None, out_dtype=None,
                      single_buffer_weights=True):
    """Build a grouped fused Linear+LayerNorm+ReLU(+eval Dropout) encoder.

    Packs the per-type weights/params into stacked, zero-padded operands ONCE
    and returns `encode(x_dict) -> dict`, so repeated calls only stage the x
    slab. `compute_dtype=jnp.bfloat16` feeds bf16 MXU operands and halves
    x/W HBM traffic on all generations (v5e/v6e/v7x); accumulation and all
    LayerNorm math stay f32 (numerics differ slightly from an f32 reference).
    """
    types = sorted(params.keys())
    H = int(params[types[0]]["w"].shape[1])
    Hp = H if H % 128 == 0 else _round_up(H, 128)      # lane-dense output
    in_dtype = (jnp.dtype(compute_dtype) if compute_dtype is not None
                else jnp.dtype(jnp.float32))
    in_align = _sublane_align(in_dtype)
    cmax = _round_up(max(int(params[t]["w"].shape[0]) for t in types), in_align)
    in_bytes = in_dtype.itemsize

    # ---- Hoisted, per-params staging (done once) ----------------------------
    w_blocks, p_blocks = [], []
    for t in types:
        w = params[t]["w"]
        c = int(w.shape[0])
        if (c, H) == (cmax, Hp) and w.dtype == in_dtype:
            wp = w                                    # already well shaped
        else:
            wp = jnp.zeros((cmax, Hp), in_dtype).at[:c, :H].set(
                w.astype(in_dtype))
        pk = jnp.zeros((3, Hp), jnp.float32)
        pk = pk.at[0, :H].set(params[t]["b"].astype(jnp.float32))
        pk = pk.at[1, :H].set(params[t]["gamma"].astype(jnp.float32))
        pk = pk.at[2, :H].set(params[t]["beta"].astype(jnp.float32))
        w_blocks.append(wp)
        p_blocks.append(pk)
    w_all = jnp.stack(w_blocks, axis=0)               # [T, cmax, Hp]
    p_all = jnp.stack(p_blocks, axis=0)               # [T, 3, Hp]

    kernel = functools.partial(_node_encoder_kernel,
                               inv_h=1.0 / float(H), h_real=H, hp=Hp)

    vmem_cap = _vmem_capacity_bytes()
    vmem_budget = int(0.70 * vmem_cap)                # ~45 MiB v7x, ~90 MiB v5e/v6e
    vmem_hard_cap = int(0.875 * vmem_cap)             # never above physical VMEM

    def encode(x_dict):
        out_dt = (jnp.dtype(out_dtype) if out_dtype is not None
                  else jnp.dtype(jnp.result_type(*(x_dict[t].dtype for t in types))))
        out_bytes = out_dt.itemsize
        align = max(in_align, _sublane_align(out_dt))

        ns = [int(x_dict[t].shape[0]) for t in types]
        total_real = sum(ns)
        max_n = max(ns)

        # Dtype-aware double-buffered VMEM estimate; weights/params are
        # single-buffered when pipeline_mode=Buffered(1) is in effect.
        w_bufs = 1 if single_buffer_weights else 2
        def vmem_est(rows):
            return (2 * rows * cmax * in_bytes        # x tile   (double buffer)
                    + w_bufs * cmax * Hp * in_bytes   # weight block
                    + w_bufs * 3 * Hp * 4             # packed bias/gamma/beta
                    + 2 * rows * Hp * out_bytes)      # out tile (double buffer)

        # Row tile: as big as the data and the VMEM budget allow.
        tm0 = tm if tm is not None else 1024
        tm_eff = _round_up(min(tm0, _round_up(max(max_n, 1), align)), align)
        while tm_eff > align and vmem_est(tm_eff) > vmem_budget:
            tm_eff = max(align, (tm_eff // 2) // align * align)

        # Don't let per-type row padding outweigh real work on small types.
        def pad_waste(rows):
            return sum(_round_up(max(n, 1), rows) - n for n in ns)
        while tm_eff > 4 * align and pad_waste(tm_eff) > total_real:
            tm_eff = max(align, (tm_eff // 2) // align * align)

        # ---- Per-call x staging (copies skipped when already well shaped) ---
        x_blocks, tile_ids, row_spans = [], [], []
        row_off = 0
        for t_idx, t in enumerate(types):
            x = x_dict[t]
            n, c = int(x.shape[0]), int(x.shape[1])
            n_pad = _round_up(max(n, 1), tm_eff)
            if (n, c) == (n_pad, cmax) and x.dtype == in_dtype:
                xp = x
            else:
                xp = jnp.zeros((n_pad, cmax), in_dtype).at[:n, :c].set(
                    x.astype(in_dtype))
            x_blocks.append(xp)
            tile_ids.extend([t_idx] * (n_pad // tm_eff))
            row_spans.append((row_off, n))
            row_off += n_pad
        x_all = x_blocks[0] if len(x_blocks) == 1 else jnp.concatenate(x_blocks, 0)
        tids = jnp.asarray(tile_ids, dtype=jnp.int32)   # [num_tiles]
        num_tiles = len(tile_ids)
        total_rows = row_off

        est = vmem_est(tm_eff) + (2 << 20)
        vmem_limit = int(min(est, vmem_hard_cap)) if est > (16 << 20) else None

        cost = pl.CostEstimate(
            flops=2 * total_rows * cmax * Hp + 10 * total_rows * Hp,
            transcendentals=total_rows,                 # one rsqrt per row
            bytes_accessed=(total_rows * cmax * in_bytes
                            + w_all.size * in_bytes + p_all.size * 4
                            + total_rows * Hp * out_bytes))

        def build_call(single_buf):
            w_mode = {"pipeline_mode": pl.Buffered(1)} if single_buf else {}
            return pl.pallas_call(
                kernel,
                out_shape=jax.ShapeDtypeStruct((total_rows, Hp), out_dt),
                grid_spec=pltpu.PrefetchScalarGridSpec(
                    num_scalar_prefetch=1,              # tids -> SMEM, fed to index_maps
                    grid=(num_tiles,),
                    in_specs=[
                        # x row tile
                        pl.BlockSpec((tm_eff, cmax), lambda i, tids_ref: (i, 0)),
                        # per-type weight block, selected by prefetched type id;
                        # constant across consecutive same-type tiles -> DMA skipped.
                        pl.BlockSpec((None, cmax, Hp),
                                     lambda i, tids_ref: (tids_ref[i], 0, 0),
                                     **w_mode),
                        # packed (bias, gamma, beta) for that type
                        pl.BlockSpec((None, 3, Hp),
                                     lambda i, tids_ref: (tids_ref[i], 0, 0),
                                     **w_mode),
                    ],
                    out_specs=pl.BlockSpec((tm_eff, Hp), lambda i, tids_ref: (i, 0)),
                ),
                compiler_params=pltpu.CompilerParams(
                    # TODO(synk): verify on v7x (2 TCs) in xprof that this axis
                    #             actually shards across cores; otherwise add an
                    #             explicit leading core axis.
                    dimension_semantics=("parallel",),
                    vmem_limit_bytes=vmem_limit,
                ),
                cost_estimate=cost,
            )

        try:
            out_all = build_call(single_buffer_weights)(tids, x_all, w_all, p_all)
        except Exception:
            if not single_buffer_weights:
                raise
            # Fallback: default double-buffered specs (always supported).
            out_all = build_call(False)(tids, x_all, w_all, p_all)

        # Slice off row padding / hidden-dim lane padding only when needed.
        out = {}
        for k, t in enumerate(types):
            start, n = row_spans[k]
            o = out_all
            if not (start == 0 and n == total_rows):
                o = o[start:start + n]
            if Hp != H:
                o = o[:, :H]
            out[t] = o
        return out

    return encode


def node_encoder(x_dict, params, **kwargs):
    """One-shot convenience wrapper.

    For repeated calls with the same params, build the encoder once with
    make_node_encoder(params) so the weight packing is hoisted out of the
    per-call path (it is a full extra HBM pass otherwise).
    """
    return make_node_encoder(params, **kwargs)(x_dict)


def init_params(key, in_channels_dict, hidden_channels):
    """Deterministic parameter init mirroring the torch module's shapes."""
    params = {}
    for node_type, c_in in sorted(in_channels_dict.items()):
        key, kw, kb = jax.random.split(key, 3)
        bound = 1.0 / jnp.sqrt(c_in)
        params[node_type] = {
            # stored already transposed vs torch nn.Linear: [C_in, H]
            "w": jax.random.uniform(kw, (c_in, hidden_channels),
                                    jnp.float32, -bound, bound),
            "b": jax.random.uniform(kb, (hidden_channels,),
                                    jnp.float32, -bound, bound),
            "gamma": jnp.ones((hidden_channels,), jnp.float32),
            "beta": jnp.zeros((hidden_channels,), jnp.float32),
        }
    return params


def _reference(x, p):
    h = x @ p["w"] + p["b"]
    mean = h.mean(-1, keepdims=True)
    var = ((h - mean) ** 2).mean(-1, keepdims=True)
    y = (h - mean) / jnp.sqrt(var + 1e-5) * p["gamma"] + p["beta"]
    return jnp.maximum(y, 0.0)


if __name__ == "__main__":
    key = jax.random.PRNGKey(0)
    hidden = 32
    in_channels_dict = {"paper": 16, "author": 8}

    k_params, k_paper, k_author = jax.random.split(key, 3)
    params = init_params(k_params, in_channels_dict, hidden)

    x_dict = {
        "paper": jax.random.normal(k_paper, (16, 16), jnp.float32),
        "author": jax.random.normal(k_author, (16, 8), jnp.float32),
    }

    # Hoisted path: pack weights once, then encode.
    encoder = make_node_encoder(params)
    out_dict = encoder(x_dict)
    out_dict = jax.tree_util.tree_map(jax.block_until_ready, out_dict)

    for nt in x_dict:
        ref = _reference(x_dict[nt], params[nt])
        assert out_dict[nt].shape == (x_dict[nt].shape[0], hidden), nt
        assert jnp.allclose(out_dict[nt], ref, atol=1e-4, rtol=1e-4), nt

    # One-shot convenience path (exercised once for coverage).
    out_dict2 = node_encoder(x_dict, params)
    out_dict2 = jax.tree_util.tree_map(jax.block_until_ready, out_dict2)
    for nt in x_dict:
        assert jnp.allclose(out_dict2[nt], out_dict[nt], atol=1e-6, rtol=1e-6), nt

    print("KERNEL_OK")
</pallas_src>

<mosaic_0001>
module attributes {stable_mosaic.version = 11 : i64} {
  func.func @_node_encoder_kernel(%arg0: i32, %arg1: memref<2xi32, #tpu.memory_space<smem>>, %arg2: memref<16x16xf32, #tpu.memory_space<vmem>>, %arg3: memref<1x16x128xf32, #tpu.memory_space<vmem>>, %arg4: memref<1x3x128xf32, #tpu.memory_space<vmem>>, %arg5: memref<16x128xf32, #tpu.memory_space<vmem>>) attributes {dimension_semantics = [#tpu.dimension_semantics<parallel>], iteration_bounds = array<i64: 2>, scalar_prefetch = 1 : i64, scratch_operands = 0 : i64, tpu.core_type = #tpu.core_type<tc>, window_params = [{transform_indices = @transform_0, window_bounds = array<i64: 16, 16>}, {pipeline_mode = #tpu.pipeline_mode<synchronous>, transform_indices = @transform_1, window_bounds = array<i64: 1, 16, 128>}, {pipeline_mode = #tpu.pipeline_mode<synchronous>, transform_indices = @transform_2, window_bounds = array<i64: 1, 3, 128>}, {transform_indices = @transform_3, window_bounds = array<i64: 16, 128>}]} {
    %c0 = arith.constant 0 : index
    %c0_0 = arith.constant 0 : index
    %0 = vector.load %arg2[%c0, %c0_0] : memref<16x16xf32, #tpu.memory_space<vmem>>, vector<16x16xf32>
    %c0_1 = arith.constant 0 : index
    %c0_2 = arith.constant 0 : index
    %c0_3 = arith.constant 0 : index
    %1 = vector.load %arg3[%c0_1, %c0_2, %c0_3] : memref<1x16x128xf32, #tpu.memory_space<vmem>>, vector<1x16x128xf32>
    %2 = vector.shape_cast %1 : vector<1x16x128xf32> to vector<16x128xf32>
    %cst = arith.constant dense<0.000000e+00> : vector<16x128xf32>
    %3 = tpu.matmul %0, %2, %cst {dimension_numbers = #tpu.dot_dimension_numbers<[1], [0], [0], [1], [0, 0, 1, 1], [], []>} : vector<16x16xf32>, vector<16x128xf32>, vector<16x128xf32> -> vector<16x128xf32>
    %c0_4 = arith.constant 0 : index
    %c0_5 = arith.constant 0 : index
    %c0_6 = arith.constant 0 : index
    %4 = vector.load %arg4[%c0_4, %c0_5, %c0_6] : memref<1x3x128xf32, #tpu.memory_space<vmem>>, vector<1x3x128xf32>
    %5 = vector.shape_cast %4 : vector<1x3x128xf32> to vector<3x128xf32>
    %6 = vector.extract_strided_slice %5 {offsets = [0, 0], sizes = [1, 128], strides = [1, 1]} : vector<3x128xf32> to vector<1x128xf32>
    %7 = vector.broadcast %6 : vector<1x128xf32> to vector<16x128xf32>
    %8 = arith.addf %3, %7 : vector<16x128xf32>
    %cst_7 = arith.constant dense<0.000000e+00> : vector<16xf32>
    %9 = vector.multi_reduction <add>, %8, %cst_7 [1] : vector<16x128xf32> to vector<16xf32>
    %10 = vector.shape_cast %9 : vector<16xf32> to vector<16x1xf32>
    %cst_8 = arith.constant 3.125000e-02 : f32
    %11 = vector.broadcast %cst_8 : f32 to vector<16x1xf32>
    %12 = arith.mulf %10, %11 : vector<16x1xf32>
    %13 = vector.broadcast %12 : vector<16x1xf32> to vector<16x128xf32>
    %14 = arith.subf %8, %13 : vector<16x128xf32>
    %15 = tpu.iota {dimensions = array<i32: 1>} : vector<16x128xi32>
    %c32_i32 = arith.constant 32 : i32
    %16 = vector.broadcast %c32_i32 : i32 to vector<16x128xi32>
    %17 = arith.cmpi slt, %15, %16 : vector<16x128xi32>
    %cst_9 = arith.constant 0.000000e+00 : f32
    %18 = vector.broadcast %cst_9 : f32 to vector<16x128xf32>
    %19 = arith.select %17, %14, %18 : vector<16x128xi1>, vector<16x128xf32>
    %20 = arith.mulf %19, %19 : vector<16x128xf32>
    %cst_10 = arith.constant dense<0.000000e+00> : vector<16xf32>
    %21 = vector.multi_reduction <add>, %20, %cst_10 [1] : vector<16x128xf32> to vector<16xf32>
    %22 = vector.shape_cast %21 : vector<16xf32> to vector<16x1xf32>
    %cst_11 = arith.constant 3.125000e-02 : f32
    %23 = vector.broadcast %cst_11 : f32 to vector<16x1xf32>
    %24 = arith.mulf %22, %23 : vector<16x1xf32>
    %cst_12 = arith.constant 9.99999974E-6 : f32
    %25 = vector.broadcast %cst_12 : f32 to vector<16x1xf32>
    %26 = arith.addf %24, %25 : vector<16x1xf32>
    %27 = math.rsqrt %26 : vector<16x1xf32>
    %28 = vector.broadcast %27 : vector<16x1xf32> to vector<16x128xf32>
    %29 = arith.mulf %19, %28 : vector<16x128xf32>
    %30 = vector.extract_strided_slice %5 {offsets = [1, 0], sizes = [1, 128], strides = [1, 1]} : vector<3x128xf32> to vector<1x128xf32>
    %31 = vector.broadcast %30 : vector<1x128xf32> to vector<16x128xf32>
    %32 = arith.mulf %29, %31 : vector<16x128xf32>
    %33 = vector.extract_strided_slice %5 {offsets = [2, 0], sizes = [1, 128], strides = [1, 1]} : vector<3x128xf32> to vector<1x128xf32>
    %34 = vector.broadcast %33 : vector<1x128xf32> to vector<16x128xf32>
    %35 = arith.addf %32, %34 : vector<16x128xf32>
    %cst_13 = arith.constant 0.000000e+00 : f32
    %36 = vector.broadcast %cst_13 : f32 to vector<16x128xf32>
    %37 = arith.maximumf %35, %36 : vector<16x128xf32>
    %c0_14 = arith.constant 0 : index
    %c0_15 = arith.constant 0 : index
    %38 = vector.load %arg5[%c0_14, %c0_15] : memref<16x128xf32, #tpu.memory_space<vmem>>, vector<16x128xf32>
    tpu.vector_store %arg5[%c0_14, %c0_15], %37 {strides = array<i32>} : memref<16x128xf32, #tpu.memory_space<vmem>>, vector<16x128xf32>,
    return
  }
  func.func @transform_0(%arg0: i32, %arg1: memref<2xi32, #tpu.memory_space<smem>>) -> (i32, i32) {
    %c0_i32 = arith.constant 0 : i32
    %c0_i32_0 = arith.constant 0 : i32
    return %arg0, %c0_i32 : i32, i32
  }
  func.func @transform_1(%arg0: i32, %arg1: memref<2xi32, #tpu.memory_space<smem>>) -> (i32, i32, i32) {
    %0 = arith.index_cast %arg0 : i32 to index
    %1 = memref.load %arg1[%0] : memref<2xi32, #tpu.memory_space<smem>>
    %c0_i32 = arith.constant 0 : i32
    %c0_i32_0 = arith.constant 0 : i32
    %c0_i32_1 = arith.constant 0 : i32
    return %1, %c0_i32, %c0_i32_0 : i32, i32, i32
  }
  func.func @transform_2(%arg0: i32, %arg1: memref<2xi32, #tpu.memory_space<smem>>) -> (i32, i32, i32) {
    %0 = arith.index_cast %arg0 : i32 to index
    %1 = memref.load %arg1[%0] : memref<2xi32, #tpu.memory_space<smem>>
    %c0_i32 = arith.constant 0 : i32
    %c0_i32_0 = arith.constant 0 : i32
    %c0_i32_1 = arith.constant 0 : i32
    return %1, %c0_i32, %c0_i32_0 : i32, i32, i32
  }
  func.func @transform_3(%arg0: i32, %arg1: memref<2xi32, #tpu.memory_space<smem>>) -> (i32, i32) {
    %c0_i32 = arith.constant 0 : i32
    %c0_i32_0 = arith.constant 0 : i32
    return %arg0, %c0_i32 : i32, i32
  }
}

module attributes {stable_mosaic.version = 11 : i64} {
  func.func @_node_encoder_kernel(%arg0: i32, %arg1: memref<2xi32, #tpu.memory_space<smem>>, %arg2: memref<16x16xf32, #tpu.memory_space<vmem>>, %arg3: memref<1x16x128xf32, #tpu.memory_space<vmem>>, %arg4: memref<1x3x128xf32, #tpu.memory_space<vmem>>, %arg5: memref<16x128xf32, #tpu.memory_space<vmem>>) attributes {dimension_semantics = [#tpu.dimension_semantics<parallel>], iteration_bounds = array<i64: 2>, scalar_prefetch = 1 : i64, scratch_operands = 0 : i64, tpu.core_type = #tpu.core_type<tc>, window_params = [{transform_indices = @transform_0, window_bounds = array<i64: 16, 16>}, {transform_indices = @transform_1, window_bounds = array<i64: 1, 16, 128>}, {transform_indices = @transform_2, window_bounds = array<i64: 1, 3, 128>}, {transform_indices = @transform_3, window_bounds = array<i64: 16, 128>}]} {
    %c0 = arith.constant 0 : index
    %c0_0 = arith.constant 0 : index
    %0 = vector.load %arg2[%c0, %c0_0] : memref<16x16xf32, #tpu.memory_space<vmem>>, vector<16x16xf32>
    %c0_1 = arith.constant 0 : index
    %c0_2 = arith.constant 0 : index
    %c0_3 = arith.constant 0 : index
    %1 = vector.load %arg3[%c0_1, %c0_2, %c0_3] : memref<1x16x128xf32, #tpu.memory_space<vmem>>, vector<1x16x128xf32>
    %2 = vector.shape_cast %1 : vector<1x16x128xf32> to vector<16x128xf32>
    %cst = arith.constant dense<0.000000e+00> : vector<16x128xf32>
    %3 = tpu.matmul %0, %2, %cst {dimension_numbers = #tpu.dot_dimension_numbers<[1], [0], [0], [1], [0, 0, 1, 1], [], []>} : vector<16x16xf32>, vector<16x128xf32>, vector<16x128xf32> -> vector<16x128xf32>
    %c0_4 = arith.constant 0 : index
    %c0_5 = arith.constant 0 : index
    %c0_6 = arith.constant 0 : index
    %4 = vector.load %arg4[%c0_4, %c0_5, %c0_6] : memref<1x3x128xf32, #tpu.memory_space<vmem>>, vector<1x3x128xf32>
    %5 = vector.shape_cast %4 : vector<1x3x128xf32> to vector<3x128xf32>
    %6 = vector.extract_strided_slice %5 {offsets = [0, 0], sizes = [1, 128], strides = [1, 1]} : vector<3x128xf32> to vector<1x128xf32>
    %7 = vector.broadcast %6 : vector<1x128xf32> to vector<16x128xf32>
    %8 = arith.addf %3, %7 : vector<16x128xf32>
    %cst_7 = arith.constant dense<0.000000e+00> : vector<16xf32>
    %9 = vector.multi_reduction <add>, %8, %cst_7 [1] : vector<16x128xf32> to vector<16xf32>
    %10 = vector.shape_cast %9 : vector<16xf32> to vector<16x1xf32>
    %cst_8 = arith.constant 3.125000e-02 : f32
    %11 = vector.broadcast %cst_8 : f32 to vector<16x1xf32>
    %12 = arith.mulf %10, %11 : vector<16x1xf32>
    %13 = vector.broadcast %12 : vector<16x1xf32> to vector<16x128xf32>
    %14 = arith.subf %8, %13 : vector<16x128xf32>
    %15 = tpu.iota {dimensions = array<i32: 1>} : vector<16x128xi32>
    %c32_i32 = arith.constant 32 : i32
    %16 = vector.broadcast %c32_i32 : i32 to vector<16x128xi32>
    %17 = arith.cmpi slt, %15, %16 : vector<16x128xi32>
    %cst_9 = arith.constant 0.000000e+00 : f32
    %18 = vector.broadcast %cst_9 : f32 to vector<16x128xf32>
    %19 = arith.select %17, %14, %18 : vector<16x128xi1>, vector<16x128xf32>
    %20 = arith.mulf %19, %19 : vector<16x128xf32>
    %cst_10 = arith.constant dense<0.000000e+00> : vector<16xf32>
    %21 = vector.multi_reduction <add>, %20, %cst_10 [1] : vector<16x128xf32> to vector<16xf32>
    %22 = vector.shape_cast %21 : vector<16xf32> to vector<16x1xf32>
    %cst_11 = arith.constant 3.125000e-02 : f32
    %23 = vector.broadcast %cst_11 : f32 to vector<16x1xf32>
    %24 = arith.mulf %22, %23 : vector<16x1xf32>
    %cst_12 = arith.constant 9.99999974E-6 : f32
    %25 = vector.broadcast %cst_12 : f32 to vector<16x1xf32>
    %26 = arith.addf %24, %25 : vector<16x1xf32>
    %27 = math.rsqrt %26 : vector<16x1xf32>
    %28 = vector.broadcast %27 : vector<16x1xf32> to vector<16x128xf32>
    %29 = arith.mulf %19, %28 : vector<16x128xf32>
    %30 = vector.extract_strided_slice %5 {offsets = [1, 0], sizes = [1, 128], strides = [1, 1]} : vector<3x128xf32> to vector<1x128xf32>
    %31 = vector.broadcast %30 : vector<1x128xf32> to vector<16x128xf32>
    %32 = arith.mulf %29, %31 : vector<16x128xf32>
    %33 = vector.extract_strided_slice %5 {offsets = [2, 0], sizes = [1, 128], strides = [1, 1]} : vector<3x128xf32> to vector<1x128xf32>
    %34 = vector.broadcast %33 : vector<1x128xf32> to vector<16x128xf32>
    %35 = arith.addf %32, %34 : vector<16x128xf32>
    %cst_13 = arith.constant 0.000000e+00 : f32
    %36 = vector.broadcast %cst_13 : f32 to vector<16x128xf32>
    %37 = arith.maximumf %35, %36 : vector<16x128xf32>
    %c0_14 = arith.constant 0 : index
    %c0_15 = arith.constant 0 : index
    %38 = vector.load %arg5[%c0_14, %c0_15] : memref<16x128xf32, #tpu.memory_space<vmem>>, vector<16x128xf32>
    tpu.vector_store %arg5[%c0_14, %c0_15], %37 {strides = array<i32>} : memref<16x128xf32, #tpu.memory_space<vmem>>, vector<16x128xf32>,
    return
  }
  func.func @transform_0(%arg0: i32, %arg1: memref<2xi32, #tpu.memory_space<smem>>) -> (i32, i32) {
    %c0_i32 = arith.constant 0 : i32
    %c0_i32_0 = arith.constant 0 : i32
    return %arg0, %c0_i32 : i32, i32
  }
  func.func @transform_1(%arg0: i32, %arg1: memref<2xi32, #tpu.memory_space<smem>>) -> (i32, i32, i32) {
    %0 = arith.index_cast %arg0 : i32 to index
    %1 = memref.load %arg1[%0] : memref<2xi32, #tpu.memory_space<smem>>
    %c0_i32 = arith.constant 0 : i32
    %c0_i32_0 = arith.constant 0 : i32
    %c0_i32_1 = arith.constant 0 : i32
    return %1, %c0_i32, %c0_i32_0 : i32, i32, i32
  }
  func.func @transform_2(%arg0: i32, %arg1: memref<2xi32, #tpu.memory_space<smem>>) -> (i32, i32, i32) {
    %0 = arith.index_cast %arg0 : i32 to index
    %1 = memref.load %arg1[%0] : memref<2xi32, #tpu.memory_space<smem>>
    %c0_i32 = arith.constant 0 : i32
    %c0_i32_0 = arith.constant 0 : i32
    %c0_i32_1 = arith.constant 0 : i32
    return %1, %c0_i32, %c0_i32_0 : i32, i32, i32
  }
  func.func @transform_3(%arg0: i32, %arg1: memref<2xi32, #tpu.memory_space<smem>>) -> (i32, i32) {
    %c0_i32 = arith.constant 0 : i32
    %c0_i32_0 = arith.constant 0 : i32
    return %arg0, %c0_i32 : i32, i32
  }
}

</mosaic_0001>

<bundles_post_ra>
// kernel: tpu_custom_call.1
= control target key start
LH: loop header
LB: loop body
LE: loop exit
PB: predicated region body
PF: predicated region fallthrough
CT: control target
= control target key end

     0   :  { %s770_s0 = inlined_call_operand.vmem [shape: s32[2], index: 0, kind: input, shape index: {}]   ;;  %s771_s1 = inlined_call_operand.vmem [shape: f32[32,16], index: 1, kind: input, shape index: {}]   ;;  %s772_s2 = inlined_call_operand.vmem [shape: f32[2,16,128], index: 2, kind: input, shape index: {}]   ;;  %s773_s3 = inlined_call_operand.vmem [shape: f32[2,3,128], index: 3, kind: input, shape index: {}]   ;;  %s774_s4 = inlined_call_operand.hbm [shape: f32[32,128], index: 4, kind: output, shape index: {}]  }
   0x1   :  { %s9_s17 = sshll.u32 %s770_s0, 4  ;;  %s10_s17 = int_to_ptr.vmem [resolvable:$true] %s9_s17 }
   0x2   :  { %s550_s18 = scalar_lea.vmem %s10_s17, 16  ;;  %p555_p1 = scmp.lt.s32.totalorder %s10_s17, %s10_s17 }
   0x3   :  { %p551_p0 = scmp.ne.s32.totalorder %s10_s17, %s550_s18  ;;  %p556_p2 = scmp.lt.s32.totalorder %s550_s18, %s550_s18 }
   0x5   :  { %p557_p3 = por %p556_p2, %p555_p1 }
   0x7   :  { %p558_p4 = pnand %p557_p3, %p551_p0 }
   0x9   :  { %561 = shalt.err (!%p558_p4)  }
   0xa   :  { %s628_s19 = smov [#allocation3]  }
   0xb   :  { %12 = dma.vmem_to_smem %s10_s17, 16, %s628_s19, [#allocation2] }
   0xc   :  { %606 = dma.done.wait [#allocation2], 16 }
   0xd   :  { %607 = vsyncadd [#allocation2], 4294967280 }
   0xe   :  { %14 = sfence }
   0xf   :  { %15 = vsyncpa [#allocation5], 0 }
  0x10   :  { %17 = vsyncpa [#allocation5 + $0x1], 0  ;;  %s660_s20 = smov 0   ;;  %s662_s21 = smov 0  }
  0x11   :  { %s664_s0 = smov 0   ;;  %s666_s22 = smov 0  }
  0x12 LB: > { %s681_s23 = sadd.s32 4294967295, %s626_s22   ;;  %s470_s24 = sadd.s32 4294967294, %s626_s22   ;;  %s626_s22 = sphi %s666_s22, %s780_s22   ;;  %s622_s0 = sphi %s664_s0, %s779_s0   ;;  %s618_s21 = sphi %s662_s21, %s778_s21   ;;  %s614_s20 = sphi %s660_s20, %s777_s20  }
  0x13   : > { %s685_s25 = sadd.s32 1, %s626_s22   ;;  %s112_s26 = sadd.s32 1, %s622_s0 }
  0x14   : > { %s109_s27 = ssub.s32 %s626_s22, %s685_s25  ;;  %p122_p5 = scmp.ne.s32.totalorder %s622_s0, %s618_s21 }
  0x15   : > { %p110_p6 = scmp.eq.s32.totalorder %s109_s27, 0  ;;  %p123_p7 = scmp.eq.s32.totalorder %s681_s23, 1 }
  0x16   : > { %p128_p8 = scmp.ne.s32.totalorder %s618_s21, %s614_s20  ;;  %p129_p9 = scmp.eq.s32.totalorder %s470_s24, 1 }
  0x17   : > { %s696_s28 = scalar_select %p110_p6, %s622_s0, %s112_s26  }
  0x18   : > { %p698_p10 = por %p123_p7, %p122_p5  ;;  %p702_p11 = por %p129_p9, %p128_p8 }
  0x19   : > { %p473_p12 = scmp.ge.s32.totalorder %s626_s22, 1  ;;  %p175_p13 = scmp.lt.s32.totalorder %s626_s22, 3 }
  0x1b   : > { %p176_p0 = pnand %p473_p12, %p175_p13 }
  0x1c   : > { %s216_s5 = sld [smem:[#allocation3 + %s681_s23]] (!%p176_p0)  ;;  %s475_s6 = sshll.u32 (!%p176_p0), %s681_s23, 1  ;;  %vm239_vm0 = vcmask (!%p176_p0), 130048   ;;  %v235_v5 = vlaneseq (!%p176_p0) }
  0x1d   : > { %179 = sbr.rel (%p176_p0) target bundleno = 595 (0x253), region = 32  ;;  %p211_p1 = scmp.lt.s32.totalorder (!%p176_p0), %s475_s6, 3 }
  0x1e   : > { %s223_s15 = sld [smem:[#allocation3 + %s681_s23]] (!%p176_p0)  ;;  %v236_v6 = vshrl.u32 (!%p176_p0), %v235_v5, 7  ;;  %v330_v14 = vand.u32 (!%p176_p0), 127, %v235_v5  ;;  %s207_s24 = sand.u32 (!%p176_p0), 1, %s618_s21  }
  0x1f   : > { %s474_s26 = sshll.u32 (!%p176_p0), %s207_s24, 4  ;;  %s488_s27 = sshll.u32 (!%p176_p0), %s681_s23, 8 }
  0x20   : > { %v237_v7 = vsub.s32 (!%p176_p0), 0, %v236_v6  ;;  %vm331_vm1 = vcmp.lt.s32.totalorder (!%p176_p0), %v330_v14, 32  ;;  %v350_v31 = vsub.s32 (!%p176_p0), 1, %v236_v6  ;;  %v356_v32 = vsub.s32 (!%p176_p0), 2, %v236_v6  ;;  %s725_s9 = scalar_lea.hbm (!%p176_p0), %s774_s4, %s488_s27  ;;  %s629_s23 = smov (!%p176_p0), [#allocation4]  }
  0x21   : > { %s566_s12 = sshll.u32 (!%p176_p0), %s629_s23, 4  ;;  %s567_s12 = int_to_ptr.vmem [resolvable:$false] %s566_s12 }
  0x22   : > { %p217_p2 = scmp.lt.s32.totalorder (!%p176_p0), %s216_s5, 1  ;;  %s568_s13 = scalar_lea.vmem (!%p176_p0), %s567_s12, 512 }
  0x24   : > { %s782_s6 = smov (!%p211_p1, %s475_s6), 3  ;;  %s784_s5 = smov (!%p217_p2, %s216_s5), 1 }
  0x25   : > { %s476_s7 = sshll.u32 %s782_s6, 3  ;;  %s487_s11 = sshll.u32 %s784_s5, 4 }
  0x26   : > { %s214_s10 = scalar_lea.vmem %s771_s1, %s476_s7  ;;  %s221_s14 = scalar_lea.vmem %s772_s2, %s487_s11 }
  0x27   : > { %v230_v0 = vld [vmem:[%s214_s10] sm:$0xff]  ;;  %v233_v2 = vld [vmem:[%s221_s14 + $0x8] sm:$0xff]  ;;  %p224_p3 = scmp.lt.s32.totalorder %s223_s15, 1  ;;  %s209_s5 = scalar_lea.vmem [#allocation4], %s474_s26 }
  0x28   : > { %497 = vmatprep.mubr.msk.f32.mxu0 %vm239_vm0, %v230_v0  ;;  %v232_v1 = vld [vmem:[%s221_s14] sm:$0xff]  ;;  %v231_v4 = vld [vmem:[%s214_s10 + $0x8] sm:$0xff]  ;;  %s378_s6 = sshll.u32 %s209_s5, 4  ;;  %s729_s10 = scalar_lea.sflag [#allocation5], %s207_s24  ;;  %s727_s6 = int_to_ptr.vmem [resolvable:$true] %s378_s6 }
  0x29   : > { %v500_v3 = vpack.c.bf16 %v233_v2, %v232_v1  ;;  %s786_s15 = smov (!%p224_p3, %s223_s15), 1  ;;  %s562_s11 = scalar_lea.vmem %s727_s6, 256 }
  0x2a   : > { %s479_s16 = sshll.u32 %s786_s15, 2  ;;  %p563_p4 = scmp.ne.s32.totalorder %s727_s6, %s562_s11 }
  0x2b   : > { %501 = vmatprep.subr.bf16.mxu0 %v500_v3  ;;  %s227_s19 = scalar_lea.vmem %s773_s3, %s479_s16  ;;  %p569_p7 = scmp.lt.s32.totalorder %s727_s6, %s567_s12 }
  0x2c   : > { %503 = vmatpush3.bf16.msra.mxu0 %v500_v3  ;;  %v234_v8 = vld [vmem:[%s227_s19] sm:$0x7]  ;;  %p564_p5 = pnand %p563_p4, %p698_p10  ;;  %p570_p8 = scmp.lt.s32.totalorder %s568_s13, %s562_s11 }
  0x2d   : > { %v238_v9 = vrot.slane %v234_v8, %v237_v7  ;;  %v351_v33 = vrot.slane %v234_v8, %v350_v31  ;;  %v357_v35 = vrot.slane %v234_v8, %v356_v32 }
  0x2e   : > { %p565_p6 = pneg %p564_p5  ;;  %p571_p9 = por %p570_p8, %p569_p7 }
  0x2f   : > { %498 = vmatmul.mubr.msk.f32.vlgmr.msra.gmra.mrb[0].mxu0 %vm239_vm0, %v231_v4 }
  0x30   : > { %p572_p12 = pnand %p571_p9, %p565_p6 }
 0x102   : > { %v499_v10 = vpop.f32.mrb[0].mxu0 }
 0x103   : > { %v312_v11 = vpop.f32.mrb[1].mxu0  ;;  %v318_v13 = vadd.f32 %v499_v10, %v238_v9 }
 0x104   : > { %v313_v12 = vadd.f32 %v312_v11, %v238_v9 }
 0x106   : > { %321 = vadd.xlane.f32.xlu0 %v313_v12 }
 0x10a   : > { %323 = vadd.xlane.f32.xlu0 %v318_v13 }
 0x193   : > { %v322_v15 = vpop.xlane.xlu0 %321 }
 0x194   : > { %v325_v16 = vmul.f32 0.03125, %v322_v15 }
 0x196   : > { %v327_v17 = vsub.f32 %v313_v12, %v325_v16 }
 0x197   : > { %v324_v18 = vpop.xlane.xlu0 %323 }
 0x198   : > { %v326_v19 = vmul.f32 0.03125, %v324_v18  ;;  %v332_v20 = vsel %vm331_vm1, %v327_v17, 0.0 }
 0x199   : > { %v334_v21 = vmul.f32 %v332_v20, %v332_v20 }
 0x19a   : > { %v328_v22 = vsub.f32 %v318_v13, %v326_v19 }
 0x19b   : > { %336 = vadd.xlane.f32.xlu1 %v334_v21 }
 0x19c   : > { %v333_v23 = vsel %vm331_vm1, %v328_v22, 0.0 }
 0x19d   : > { %v335_v24 = vmul.f32 %v333_v23, %v333_v23 }
 0x19f   : > { %338 = vadd.xlane.f32.xlu1 %v335_v24 }
 0x228   : > { %v337_v25 = vpop.xlane.xlu1 %336 }
 0x229   : > { %v340_v26 = vmul.f32 0.03125, %v337_v25 }
 0x22b   : > { %v342_v27 = vadd.f32 1e-05, %v340_v26 }
 0x22c   : > { %v339_v28 = vpop.xlane.xlu1 %338 }
 0x22d   : > { %546 = vrsqrt.f32 %v342_v27  ;;  %v341_v29 = vmul.f32 0.03125, %v339_v28 }
 0x22f   : > { %v343_v30 = vadd.f32 1e-05, %v341_v29 }
 0x231   : > { %548 = vrsqrt.f32 %v343_v30 }
 0x237   : > { %v547_v34 = vpop.eup %546 }
 0x238   : > { %v346_v36 = vmul.f32 %v547_v34, %v332_v20 }
 0x23a   : > { %v352_v37 = vmul.f32 %v351_v33, %v346_v36 }
 0x23b   : > { %v549_v38 = vpop.eup %548 }
 0x23c   : > { %v347_v39 = vmul.f32 %v549_v38, %v333_v23  ;;  %v358_v40 = vadd.f32 %v357_v35, %v352_v37 }
 0x23e   : > { %v353_v41 = vmul.f32 %v351_v33, %v347_v39  ;;  %v360_v42 = vmax.f32 %v358_v40, 0.0 }
 0x240   : > { %v359_v43 = vadd.f32 %v357_v35, %v353_v41  ;;  %362 = vst [vmem:[%s209_s5] sm:$0xff] %v360_v42 }
 0x242   : > { %v361_v44 = vmax.f32 %v359_v43, 0.0 }
 0x244   : > { %363 = vst [vmem:[%s209_s5 + $0x8] sm:$0xff] %v361_v44 }
 0x245   : > { %575 = shalt.err (!%p572_p12)
}
 0x246   : > { %s576_s14 = scalar_lea.hbm %s725_s9, 256  ;;  %s580_s17 = scalar_lea.hbm %s774_s4, 512 }
 0x247   : > { %p577_p13 = scmp.ne.s32.totalorder %s725_s9, %s576_s14  ;;  %p581_p2 = scmp.lt.u32.totalorder %s725_s9, %s774_s4 }
 0x248   : > { %p582_p3 = scmp.lt.u32.totalorder %s580_s17, %s576_s14  ;;  %p584_p5 = scmp.lt.u32.totalorder %s576_s14, %s725_s9 }
 0x249   : > { %p578_p0 = pnand %p577_p13, %p698_p10 }
 0x24a   : > { %p583_p4 = por %p582_p3, %p581_p2 }
 0x24b   : > { %p579_p1 = pneg %p578_p0 }
 0x24c   : > { %p585_p6 = por %p584_p5, %p583_p4 }
 0x24e   : > { %p586_p7 = pnand %p585_p6, %p579_p1 }
 0x250   : > { %589 = shalt.err (!%p586_p7)
}
 0x251   : > { %s630_s24 = smov 128   ;;  %s631_s26 = smov 8  }
 0x252   : > { %504 = dma.vmem_to_hbm [thread:$0]  (%p698_p10), %s727_s6, 256, %s725_s9, %s729_s10, %s630_s24, %s630_s24, %s631_s26  }
 0x253 PF: > { %p510_p8 = scmp.ge.s32.totalorder %s626_s22, 2  ;;  %s393_s27 = sand.u32 1, %s614_s20  }
 0x254   : > { %s394_s5 = scalar_lea.sflag [#allocation5], %s393_s27 }
 0x255   : > { %p507_p9 = pnand %p510_p8, %p702_p11 }
 0x257   : > { %609 = dma.done.wait (!%p507_p9), %s394_s5, 256  }
 0x258   : > { %611 = vsyncadd (!%p507_p9), %s394_s5, 4294967040  ;;  %p20_p12 = scmp.ge.s32.totalorder %s685_s25, 4   ;;  %s777_s20 = smov %s618_s21 }
 0x259   : > { %s778_s21 = smov %s622_s0  ;;  %s779_s0 = smov %s696_s28 }
 0x25a   : > { %s780_s22 = smov %s685_s25  ;;  %22 = sbr.rel (!%p20_p12) target bundleno = 18 (0x12), region = 73 }
 0x261   :  { %399 = vsyncpa [#allocation5], 1 }
 0x262   :  { %401 = vsyncpa [#allocation5 + $0x1], 1 }

// kernel: tpu_custom_call.1
= control target key start
LH: loop header
LB: loop body
LE: loop exit
PB: predicated region body
PF: predicated region fallthrough
CT: control target
= control target key end

     0   :  { %s764_s0 = inlined_call_operand.vmem [shape: s32[2], index: 0, kind: input, shape index: {}]   ;;  %s765_s1 = inlined_call_operand.vmem [shape: f32[32,16], index: 1, kind: input, shape index: {}]   ;;  %s766_s2 = inlined_call_operand.vmem [shape: f32[2,16,128], index: 2, kind: input, shape index: {}]   ;;  %s767_s3 = inlined_call_operand.vmem [shape: f32[2,3,128], index: 3, kind: input, shape index: {}]   ;;  %s768_s4 = inlined_call_operand.hbm [shape: f32[32,128], index: 4, kind: output, shape index: {}]  }
   0x1   :  { %s9_s17 = sshll.u32 %s764_s0, 4  ;;  %s10_s17 = int_to_ptr.vmem [resolvable:$true] %s9_s17 }
   0x2   :  { %s544_s18 = scalar_lea.vmem %s10_s17, 16  ;;  %p549_p1 = scmp.lt.s32.totalorder %s10_s17, %s10_s17 }
   0x3   :  { %p545_p0 = scmp.ne.s32.totalorder %s10_s17, %s544_s18  ;;  %p550_p2 = scmp.lt.s32.totalorder %s544_s18, %s544_s18 }
   0x5   :  { %p551_p3 = por %p550_p2, %p549_p1 }
   0x7   :  { %p552_p4 = pnand %p551_p3, %p545_p0 }
   0x9   :  { %555 = shalt.err (!%p552_p4)  }
   0xa   :  { %s622_s19 = smov [#allocation3]  }
   0xb   :  { %12 = dma.vmem_to_smem %s10_s17, 16, %s622_s19, [#allocation2] }
   0xc   :  { %600 = dma.done.wait [#allocation2], 16 }
   0xd   :  { %601 = vsyncadd [#allocation2], 4294967280 }
   0xe   :  { %14 = sfence }
   0xf   :  { %15 = vsyncpa [#allocation5], 0 }
  0x10   :  { %17 = vsyncpa [#allocation5 + $0x1], 0  ;;  %s654_s20 = smov 0   ;;  %s656_s21 = smov 0  }
  0x11   :  { %s658_s0 = smov 0   ;;  %s660_s22 = smov 0  }
  0x12 LB: > { %s675_s23 = sadd.s32 4294967295, %s620_s22   ;;  %s464_s24 = sadd.s32 4294967294, %s620_s22   ;;  %s620_s22 = sphi %s660_s22, %s774_s22   ;;  %s616_s0 = sphi %s658_s0, %s773_s0   ;;  %s612_s21 = sphi %s656_s21, %s772_s21   ;;  %s608_s20 = sphi %s654_s20, %s771_s20  }
  0x13   : > { %s679_s25 = sadd.s32 1, %s620_s22   ;;  %s112_s26 = sadd.s32 1, %s616_s0 }
  0x14   : > { %s109_s27 = ssub.s32 %s620_s22, %s679_s25  ;;  %p122_p5 = scmp.ne.s32.totalorder %s616_s0, %s612_s21 }
  0x15   : > { %p110_p6 = scmp.eq.s32.totalorder %s109_s27, 0  ;;  %p123_p7 = scmp.eq.s32.totalorder %s675_s23, 1 }
  0x16   : > { %p128_p8 = scmp.ne.s32.totalorder %s612_s21, %s608_s20  ;;  %p129_p9 = scmp.eq.s32.totalorder %s464_s24, 1 }
  0x17   : > { %s690_s28 = scalar_select %p110_p6, %s616_s0, %s112_s26  }
  0x18   : > { %p692_p10 = por %p123_p7, %p122_p5  ;;  %p696_p11 = por %p129_p9, %p128_p8 }
  0x19   : > { %p467_p12 = scmp.ge.s32.totalorder %s620_s22, 1  ;;  %p175_p13 = scmp.lt.s32.totalorder %s620_s22, 3 }
  0x1b   : > { %p176_p0 = pnand %p467_p12, %p175_p13 }
  0x1c   : > { %s216_s5 = sld [smem:[#allocation3 + %s675_s23]] (!%p176_p0)  ;;  %s469_s6 = sshll.u32 (!%p176_p0), %s675_s23, 1  ;;  %vm239_vm0 = vcmask (!%p176_p0), 130048   ;;  %v235_v5 = vlaneseq (!%p176_p0) }
  0x1d   : > { %179 = sbr.rel (%p176_p0) target bundleno = 595 (0x253), region = 32  ;;  %p211_p1 = scmp.lt.s32.totalorder (!%p176_p0), %s469_s6, 3 }
  0x1e   : > { %s223_s15 = sld [smem:[#allocation3 + %s675_s23]] (!%p176_p0)  ;;  %v236_v6 = vshrl.u32 (!%p176_p0), %v235_v5, 7  ;;  %v330_v14 = vand.u32 (!%p176_p0), 127, %v235_v5  ;;  %s207_s24 = sand.u32 (!%p176_p0), 1, %s612_s21  }
  0x1f   : > { %s468_s26 = sshll.u32 (!%p176_p0), %s207_s24, 4  ;;  %s482_s27 = sshll.u32 (!%p176_p0), %s675_s23, 8 }
  0x20   : > { %v237_v7 = vsub.s32 (!%p176_p0), 0, %v236_v6  ;;  %vm331_vm1 = vcmp.lt.s32.totalorder (!%p176_p0), %v330_v14, 32  ;;  %v350_v31 = vsub.s32 (!%p176_p0), 1, %v236_v6  ;;  %v356_v32 = vsub.s32 (!%p176_p0), 2, %v236_v6  ;;  %s719_s9 = scalar_lea.hbm (!%p176_p0), %s768_s4, %s482_s27  ;;  %s623_s23 = smov (!%p176_p0), [#allocation4]  }
  0x21   : > { %s560_s12 = sshll.u32 (!%p176_p0), %s623_s23, 4  ;;  %s561_s12 = int_to_ptr.vmem [resolvable:$false] %s560_s12 }
  0x22   : > { %p217_p2 = scmp.lt.s32.totalorder (!%p176_p0), %s216_s5, 1  ;;  %s562_s13 = scalar_lea.vmem (!%p176_p0), %s561_s12, 512 }
  0x24   : > { %s776_s6 = smov (!%p211_p1, %s469_s6), 3  ;;  %s778_s5 = smov (!%p217_p2, %s216_s5), 1 }
  0x25   : > { %s470_s7 = sshll.u32 %s776_s6, 3  ;;  %s481_s11 = sshll.u32 %s778_s5, 4 }
  0x26   : > { %s214_s10 = scalar_lea.vmem %s765_s1, %s470_s7  ;;  %s221_s14 = scalar_lea.vmem %s766_s2, %s481_s11 }
  0x27   : > { %v230_v0 = vld [vmem:[%s214_s10] sm:$0xff]  ;;  %v233_v2 = vld [vmem:[%s221_s14 + $0x8] sm:$0xff]  ;;  %p224_p3 = scmp.lt.s32.totalorder %s223_s15, 1  ;;  %s209_s5 = scalar_lea.vmem [#allocation4], %s468_s26 }
  0x28   : > { %491 = vmatprep.mubr.msk.f32.mxu0 %vm239_vm0, %v230_v0  ;;  %v232_v1 = vld [vmem:[%s221_s14] sm:$0xff]  ;;  %v231_v4 = vld [vmem:[%s214_s10 + $0x8] sm:$0xff]  ;;  %s378_s6 = sshll.u32 %s209_s5, 4  ;;  %s723_s10 = scalar_lea.sflag [#allocation5], %s207_s24  ;;  %s721_s6 = int_to_ptr.vmem [resolvable:$true] %s378_s6 }
  0x29   : > { %v494_v3 = vpack.c.bf16 %v233_v2, %v232_v1  ;;  %s780_s15 = smov (!%p224_p3, %s223_s15), 1  ;;  %s556_s11 = scalar_lea.vmem %s721_s6, 256 }
  0x2a   : > { %s473_s16 = sshll.u32 %s780_s15, 2  ;;  %p557_p4 = scmp.ne.s32.totalorder %s721_s6, %s556_s11 }
  0x2b   : > { %495 = vmatprep.subr.bf16.mxu0 %v494_v3  ;;  %s227_s19 = scalar_lea.vmem %s767_s3, %s473_s16  ;;  %p563_p7 = scmp.lt.s32.totalorder %s721_s6, %s561_s12 }
  0x2c   : > { %497 = vmatpush3.bf16.msra.mxu0 %v494_v3  ;;  %v234_v8 = vld [vmem:[%s227_s19] sm:$0x7]  ;;  %p558_p5 = pnand %p557_p4, %p692_p10  ;;  %p564_p8 = scmp.lt.s32.totalorder %s562_s13, %s556_s11 }
  0x2d   : > { %v238_v9 = vrot.slane %v234_v8, %v237_v7  ;;  %v351_v33 = vrot.slane %v234_v8, %v350_v31  ;;  %v357_v35 = vrot.slane %v234_v8, %v356_v32 }
  0x2e   : > { %p559_p6 = pneg %p558_p5  ;;  %p565_p9 = por %p564_p8, %p563_p7 }
  0x2f   : > { %492 = vmatmul.mubr.msk.f32.vlgmr.msra.gmra.mrb[0].mxu0 %vm239_vm0, %v231_v4 }
  0x30   : > { %p566_p12 = pnand %p565_p9, %p559_p6 }
 0x102   : > { %v493_v10 = vpop.f32.mrb[0].mxu0 }
 0x103   : > { %v312_v11 = vpop.f32.mrb[1].mxu0  ;;  %v318_v13 = vadd.f32 %v493_v10, %v238_v9 }
 0x104   : > { %v313_v12 = vadd.f32 %v312_v11, %v238_v9 }
 0x106   : > { %321 = vadd.xlane.f32.xlu0 %v313_v12 }
 0x10a   : > { %323 = vadd.xlane.f32.xlu0 %v318_v13 }
 0x193   : > { %v322_v15 = vpop.xlane.xlu0 %321 }
 0x194   : > { %v325_v16 = vmul.f32 0.03125, %v322_v15 }
 0x196   : > { %v327_v17 = vsub.f32 %v313_v12, %v325_v16 }
 0x197   : > { %v324_v18 = vpop.xlane.xlu0 %323 }
 0x198   : > { %v326_v19 = vmul.f32 0.03125, %v324_v18  ;;  %v332_v20 = vsel %vm331_vm1, %v327_v17, 0.0 }
 0x199   : > { %v334_v21 = vmul.f32 %v332_v20, %v332_v20 }
 0x19a   : > { %v328_v22 = vsub.f32 %v318_v13, %v326_v19 }
 0x19b   : > { %336 = vadd.xlane.f32.xlu1 %v334_v21 }
 0x19c   : > { %v333_v23 = vsel %vm331_vm1, %v328_v22, 0.0 }
 0x19d   : > { %v335_v24 = vmul.f32 %v333_v23, %v333_v23 }
 0x19f   : > { %338 = vadd.xlane.f32.xlu1 %v335_v24 }
 0x228   : > { %v337_v25 = vpop.xlane.xlu1 %336 }
 0x229   : > { %v340_v26 = vmul.f32 0.03125, %v337_v25 }
 0x22b   : > { %v342_v27 = vadd.f32 1e-05, %v340_v26 }
 0x22c   : > { %v339_v28 = vpop.xlane.xlu1 %338 }
 0x22d   : > { %540 = vrsqrt.f32 %v342_v27  ;;  %v341_v29 = vmul.f32 0.03125, %v339_v28 }
 0x22f   : > { %v343_v30 = vadd.f32 1e-05, %v341_v29 }
 0x231   : > { %542 = vrsqrt.f32 %v343_v30 }
 0x237   : > { %v541_v34 = vpop.eup %540 }
 0x238   : > { %v346_v36 = vmul.f32 %v541_v34, %v332_v20 }
 0x23a   : > { %v352_v37 = vmul.f32 %v351_v33, %v346_v36 }
 0x23b   : > { %v543_v38 = vpop.eup %542 }
 0x23c   : > { %v347_v39 = vmul.f32 %v543_v38, %v333_v23  ;;  %v358_v40 = vadd.f32 %v357_v35, %v352_v37 }
 0x23e   : > { %v353_v41 = vmul.f32 %v351_v33, %v347_v39  ;;  %v360_v42 = vmax.f32 %v358_v40, 0.0 }
 0x240   : > { %v359_v43 = vadd.f32 %v357_v35, %v353_v41  ;;  %362 = vst [vmem:[%s209_s5] sm:$0xff] %v360_v42 }
 0x242   : > { %v361_v44 = vmax.f32 %v359_v43, 0.0 }
 0x244   : > { %363 = vst [vmem:[%s209_s5 + $0x8] sm:$0xff] %v361_v44 }
 0x245   : > { %569 = shalt.err (!%p566_p12)
}
 0x246   : > { %s570_s14 = scalar_lea.hbm %s719_s9, 256  ;;  %s574_s17 = scalar_lea.hbm %s768_s4, 512 }
 0x247   : > { %p571_p13 = scmp.ne.s32.totalorder %s719_s9, %s570_s14  ;;  %p575_p2 = scmp.lt.u32.totalorder %s719_s9, %s768_s4 }
 0x248   : > { %p576_p3 = scmp.lt.u32.totalorder %s574_s17, %s570_s14  ;;  %p578_p5 = scmp.lt.u32.totalorder %s570_s14, %s719_s9 }
 0x249   : > { %p572_p0 = pnand %p571_p13, %p692_p10 }
 0x24a   : > { %p577_p4 = por %p576_p3, %p575_p2 }
 0x24b   : > { %p573_p1 = pneg %p572_p0 }
 0x24c   : > { %p579_p6 = por %p578_p5, %p577_p4 }
 0x24e   : > { %p580_p7 = pnand %p579_p6, %p573_p1 }
 0x250   : > { %583 = shalt.err (!%p580_p7)
}
 0x251   : > { %s624_s24 = smov 128   ;;  %s625_s26 = smov 8  }
 0x252   : > { %498 = dma.vmem_to_hbm [thread:$0]  (%p692_p10), %s721_s6, 256, %s719_s9, %s723_s10, %s624_s24, %s624_s24, %s625_s26  }
 0x253 PF: > { %p504_p8 = scmp.ge.s32.totalorder %s620_s22, 2  ;;  %s393_s27 = sand.u32 1, %s608_s20  }
 0x254   : > { %s394_s5 = scalar_lea.sflag [#allocation5], %s393_s27 }
 0x255   : > { %p501_p9 = pnand %p504_p8, %p696_p11 }
 0x257   : > { %603 = dma.done.wait (!%p501_p9), %s394_s5, 256  }
 0x258   : > { %605 = vsyncadd (!%p501_p9), %s394_s5, 4294967040  ;;  %p20_p12 = scmp.ge.s32.totalorder %s679_s25, 4   ;;  %s771_s20 = smov %s612_s21 }
 0x259   : > { %s772_s21 = smov %s616_s0  ;;  %s773_s0 = smov %s690_s28 }
 0x25a   : > { %s774_s22 = smov %s679_s25  ;;  %22 = sbr.rel (!%p20_p12) target bundleno = 18 (0x12), region = 73 }
 0x261   :  { %399 = vsyncpa [#allocation5], 1 }
 0x262   :  { %401 = vsyncpa [#allocation5 + $0x1], 1 }

</bundles_post_ra>
